<compile_context>
chip_gen: v7x
topology: tpu7x:2x2x1
jax: 0.10.0
libtpu: 0.0.40
codegen_flags: <defaults>
</compile_context>

<pallas_src>
import functools

import jax
import jax.numpy as jnp
from jax import lax
from jax.experimental import pallas as pl
from jax.experimental.pallas import tpu as pltpu


def _round_up(x, m):
    return ((x + m - 1) // m) * m


# ----------------------------------------------------------------------------
# Kernels
# ----------------------------------------------------------------------------
def _linear_kernel(x_ref, w_ref, b_ref, o_ref, *, cdt):
    # Whole-F panels.  x_ref: (tm, F), w_ref: (tn, F), b_ref: (1, tn) f32.
    # Contract F on both operands (no wrapper transpose); accumulate in f32.
    acc = lax.dot_general(
        x_ref[...].astype(cdt), w_ref[...].astype(cdt),
        dimension_numbers=(((1,), (1,)), ((), ())),
        preferred_element_type=jnp.float32)
    o_ref[...] = (acc + b_ref[...]).astype(o_ref.dtype)


def _linear_kernel_ktiled(x_ref, w_ref, b_ref, o_ref, acc_ref, *, cdt):
    # K-tiled variant: grid = (outer, inner, K), K innermost ("arbitrary").
    k = pl.program_id(2)

    @pl.when(k == 0)
    def _():
        acc_ref[...] = jnp.zeros_like(acc_ref)

    acc_ref[...] += lax.dot_general(
        x_ref[...].astype(cdt), w_ref[...].astype(cdt),
        dimension_numbers=(((1,), (1,)), ((), ())),
        preferred_element_type=jnp.float32)

    @pl.when(k == pl.num_programs(2) - 1)
    def _():
        o_ref[...] = (acc_ref[...] + b_ref[...]).astype(o_ref.dtype)


def _index_maps(class_outer, with_k):
    # Returns (x_map, w_map, b_map, o_map) for the chosen grid ordering.
    if with_k:
        if class_outer:
            return (lambda j, i, k: (i, k),
                    lambda j, i, k: (j, k),
                    lambda j, i, k: (0, j),
                    lambda j, i, k: (i, j))
        return (lambda i, j, k: (i, k),
                lambda i, j, k: (j, k),
                lambda i, j, k: (0, j),
                lambda i, j, k: (i, j))
    if class_outer:
        return (lambda j, i: (i, 0),
                lambda j, i: (j, 0),
                lambda j, i: (0, j),
                lambda j, i: (i, j))
    return (lambda i, j: (i, 0),
            lambda i, j: (j, 0),
            lambda i, j: (0, j),
            lambda i, j: (i, j))


# ----------------------------------------------------------------------------
# Wrapper
# ----------------------------------------------------------------------------
@functools.partial(jax.jit, static_argnames=("compute_dtype",))
def alexnet_classifier_forward(feat, weight, bias, *, compute_dtype=None):
    """feat: (B, F); weight: (C, F); bias: (C,) -> (B, C) in feat.dtype."""
    B, F = feat.shape
    C = weight.shape[0]
    out_dtype = jnp.dtype(feat.dtype)
    cdt = jnp.dtype(compute_dtype) if compute_dtype is not None else out_dtype

    x_it = jnp.dtype(feat.dtype).itemsize
    w_it = jnp.dtype(weight.dtype).itemsize
    out_it = out_dtype.itemsize

    # Per-generation VMEM / tile budgets.
    try:
        vmem_cap = int(pltpu.get_tpu_info().vmem_capacity_bytes)
    except Exception:
        vmem_cap = 64 << 20  # conservative fallback (v7x-sized)
    vmem_budget = max(16 << 20, min(vmem_cap - (16 << 20), int(0.8 * vmem_cap)))
    tm_cap = 512 if vmem_cap >= (96 << 20) else 256

    # --- Class (N) tiling: no padding when C is small. --------------------
    if C < 128:
        tn, Cp = C, C                      # full-array block, masked vst only
    else:
        tn = 256 if (C >= 512 and vmem_cap >= (96 << 20)) else 128
        Cp = _round_up(C, tn)

    # --- Batch (M) tiling. -------------------------------------------------
    align = 16 if cdt == jnp.dtype(jnp.bfloat16) else 8
    if B <= 64:
        tm, Bp = B, B                      # tiny batch: one full-array M block
    else:
        # split into >=2 M tiles (megacore on v7x), sublane/packing aligned
        tm = min(tm_cap, _round_up(-(-B // 2), align))
        Bp = _round_up(B, tm)
    gM, gN = Bp // tm, Cp // tn

    # --- Feature (K) tiling: only when whole-F panels blow the VMEM budget.
    fixed = 2 * tn * 4 + 2 * tm * tn * out_it + tm * tn * 4
    per_k = 2 * (tm * x_it + tn * w_it)    # double-buffered x + w panels / unit K
    if fixed + per_k * F <= vmem_budget:
        tk, Fp, gK = F, F, 1
    else:
        tk = max(512, ((vmem_budget - fixed) // per_k) // 512 * 512)
        Fp = _round_up(F, tk)
        gK = Fp // tk

    # --- Zero padding (exact: padded rows/cols/K contribute zero, sliced off).
    pad_b, pad_c, pad_f = Bp - B, Cp - C, Fp - F
    x = feat if (pad_b == 0 and pad_f == 0) else jnp.pad(feat, ((0, pad_b), (0, pad_f)))
    w = weight if (pad_c == 0 and pad_f == 0) else jnp.pad(weight, ((0, pad_c), (0, pad_f)))
    b2d = (bias if pad_c == 0 else jnp.pad(bias, (0, pad_c)))
    b2d = b2d.reshape(1, Cp).astype(jnp.float32)   # bias stays f32 (f32 accumulate)

    # --- Grid ordering: keep the larger operand resident across inner steps.
    class_outer = bool(gM > 1 and gN > 1 and (Cp * w_it > Bp * x_it))
    x_map, w_map, b_map, o_map = _index_maps(class_outer, gK > 1)

    vmem_bytes = int(min(vmem_budget, fixed + per_k * tk + (4 << 20)))
    cost = pl.CostEstimate(
        flops=int(2 * B * C * F),
        transcendentals=0,
        bytes_accessed=int(B * F * x_it + C * F * w_it + C * 4 + B * C * out_it))

    if gK == 1:
        out = pl.pallas_call(
            functools.partial(_linear_kernel, cdt=cdt),
            out_shape=jax.ShapeDtypeStruct((Bp, Cp), out_dtype),
            grid=(gN, gM) if class_outer else (gM, gN),
            in_specs=[
                pl.BlockSpec((tm, Fp), x_map),   # activation panel
                pl.BlockSpec((tn, Fp), w_map),   # weight panel (no transpose)
                pl.BlockSpec((1, tn), b_map),    # bias panel
            ],
            out_specs=pl.BlockSpec((tm, tn), o_map),
            compiler_params=pltpu.CompilerParams(
                dimension_semantics=("parallel", "parallel"),
                vmem_limit_bytes=vmem_bytes),
            cost_estimate=cost,
        )(x, w, b2d)
    else:
        out = pl.pallas_call(
            functools.partial(_linear_kernel_ktiled, cdt=cdt),
            out_shape=jax.ShapeDtypeStruct((Bp, Cp), out_dtype),
            grid=((gN, gM, gK) if class_outer else (gM, gN, gK)),
            in_specs=[
                pl.BlockSpec((tm, tk), x_map),
                pl.BlockSpec((tn, tk), w_map),
                pl.BlockSpec((1, tn), b_map),
            ],
            out_specs=pl.BlockSpec((tm, tn), o_map),
            scratch_shapes=[pltpu.VMEM((tm, tn), jnp.float32)],
            compiler_params=pltpu.CompilerParams(
                dimension_semantics=("parallel", "parallel", "arbitrary"),
                vmem_limit_bytes=vmem_bytes),
            cost_estimate=cost,
        )(x, w, b2d)

    if pad_b or pad_c:
        out = out[:B, :C]
    return out


def init_params(key, num_feat, num_classes, dtype=jnp.float32):
    # Deterministic init mimicking nn.Linear default:
    # uniform(-1/sqrt(fan_in), 1/sqrt(fan_in)).
    kw, kb = jax.random.split(key)
    bound = 1.0 / jnp.sqrt(jnp.asarray(num_feat, dtype))
    weight = jax.random.uniform(kw, (num_classes, num_feat), dtype,
                                minval=-bound, maxval=bound)
    bias = jax.random.uniform(kb, (num_classes,), dtype,
                              minval=-bound, maxval=bound)
    return weight, bias


if __name__ == "__main__":
    # Small shapes consistent with the module: opt = {'num_classes': 16, 'num_feat': 128}
    B, NUM_FEAT, NUM_CLASSES = 2, 128, 16

    key = jax.random.PRNGKey(0)
    k_feat, k_params = jax.random.split(key)

    feat = jax.random.normal(k_feat, (B, NUM_FEAT), jnp.float32)
    weight, bias = init_params(k_params, NUM_FEAT, NUM_CLASSES)

    # Reference (same semantics as torch nn.Linear).
    ref = feat @ weight.T + bias

    # Default f32 path — exact to tight tolerance (no padding/cast for C<128).
    out = alexnet_classifier_forward(feat, weight, bias)
    out = jax.block_until_ready(out)
    assert out.shape == (B, NUM_CLASSES)
    assert jnp.allclose(out, ref, atol=1e-5, rtol=1e-5)

    # bf16 compute path (in-kernel cast, f32 accumulation) — MXU fast path.
    out_bf16 = alexnet_classifier_forward(feat, weight, bias,
                                          compute_dtype=jnp.bfloat16)
    out_bf16 = jax.block_until_ready(out_bf16)
    assert out_bf16.shape == (B, NUM_CLASSES)
    assert jnp.allclose(out_bf16, ref, atol=5e-2, rtol=5e-2)

    print("KERNEL_OK")
</pallas_src>

<mosaic_0001>
module attributes {stable_mosaic.version = 11 : i64} {
  func.func @_linear_kernel(%arg0: i32, %arg1: i32, %arg2: memref<2x128xf32, #tpu.memory_space<vmem>>, %arg3: memref<16x128xf32, #tpu.memory_space<vmem>>, %arg4: memref<1x16xf32, #tpu.memory_space<vmem>>, %arg5: memref<2x16xf32, #tpu.memory_space<vmem>>) attributes {dimension_semantics = [#tpu.dimension_semantics<parallel>, #tpu.dimension_semantics<parallel>], iteration_bounds = array<i64: 1, 1>, scalar_prefetch = 0 : i64, scratch_operands = 0 : i64, tpu.core_type = #tpu.core_type<tc>, window_params = [{transform_indices = @transform_0, window_bounds = array<i64: 2, 128>}, {transform_indices = @transform_1, window_bounds = array<i64: 16, 128>}, {transform_indices = @transform_2, window_bounds = array<i64: 1, 16>}, {transform_indices = @transform_3, window_bounds = array<i64: 2, 16>}]} {
    %c0 = arith.constant 0 : index
    %c0_0 = arith.constant 0 : index
    %0 = vector.load %arg2[%c0, %c0_0] : memref<2x128xf32, #tpu.memory_space<vmem>>, vector<2x128xf32>
    %c0_1 = arith.constant 0 : index
    %c0_2 = arith.constant 0 : index
    %1 = vector.load %arg3[%c0_1, %c0_2] : memref<16x128xf32, #tpu.memory_space<vmem>>, vector<16x128xf32>
    %cst = arith.constant dense<0.000000e+00> : vector<2x16xf32>
    %2 = tpu.matmul %0, %1, %cst {dimension_numbers = #tpu.dot_dimension_numbers<[1], [1], [0], [0], [0, 0, 1, 0], [], []>} : vector<2x128xf32>, vector<16x128xf32>, vector<2x16xf32> -> vector<2x16xf32>
    %c0_3 = arith.constant 0 : index
    %c0_4 = arith.constant 0 : index
    %3 = vector.load %arg4[%c0_3, %c0_4] : memref<1x16xf32, #tpu.memory_space<vmem>>, vector<1x16xf32>
    %4 = vector.broadcast %3 : vector<1x16xf32> to vector<2x16xf32>
    %5 = arith.addf %2, %4 : vector<2x16xf32>
    %c0_5 = arith.constant 0 : index
    %c0_6 = arith.constant 0 : index
    %6 = vector.load %arg5[%c0_5, %c0_6] : memref<2x16xf32, #tpu.memory_space<vmem>>, vector<2x16xf32>
    tpu.vector_store %arg5[%c0_5, %c0_6], %5 {strides = array<i32>} : memref<2x16xf32, #tpu.memory_space<vmem>>, vector<2x16xf32>,
    return
  }
  func.func @transform_0(%arg0: i32, %arg1: i32) -> (i32, i32) {
    %c0_i32 = arith.constant 0 : i32
    %c0_i32_0 = arith.constant 0 : i32
    return %arg0, %c0_i32 : i32, i32
  }
  func.func @transform_1(%arg0: i32, %arg1: i32) -> (i32, i32) {
    %c0_i32 = arith.constant 0 : i32
    %c0_i32_0 = arith.constant 0 : i32
    return %arg1, %c0_i32 : i32, i32
  }
  func.func @transform_2(%arg0: i32, %arg1: i32) -> (i32, i32) {
    %c0_i32 = arith.constant 0 : i32
    %c0_i32_0 = arith.constant 0 : i32
    return %c0_i32, %arg1 : i32, i32
  }
  func.func @transform_3(%arg0: i32, %arg1: i32) -> (i32, i32) {
    %c0_i32 = arith.constant 0 : i32
    return %arg0, %arg1 : i32, i32
  }
}

</mosaic_0001>

<bundles_post_ra>
// kernel: alexnet_classifier_forward.1
= control target key start
LH: loop header
LB: loop body
LE: loop exit
PB: predicated region body
PF: predicated region fallthrough
CT: control target
= control target key end

     0   :  { %8 = vsyncpa [#allocation3], 0  ;;  %s252_s0 = inlined_call_operand.vmem [shape: f32[2,128], index: 0, kind: input, shape index: {}]   ;;  %s253_s1 = inlined_call_operand.hbm [shape: f32[16,128], index: 1, kind: input, shape index: {}]   ;;  %s254_s2 = inlined_call_operand.vmem [shape: f32[1,16], index: 2, kind: input, shape index: {}]   ;;  %s255_s3 = inlined_call_operand.hbm [shape: f32[2,16], index: 3, kind: output, shape index: {}]  }
   0x1   :  { %9 = vsyncpa [#allocation4], 0  ;;  %s195_s12 = smov [#allocation2]   ;;  %s147_s16 = scalar_lea.hbm %s253_s1, 256 }
   0x2   :  { %s17_s13 = sshll.u32 %s195_s12, 4  ;;  %p148_p0 = scmp.ne.s32.totalorder %s253_s1, %s147_s16  ;;  %s18_s13 = int_to_ptr.vmem [resolvable:$true] %s17_s13 }
   0x3   :  { %p151_p1 = scmp.lt.u32.totalorder %s147_s16, %s253_s1 }
   0x5   :  { %p153_p2 = pnand %p151_p1, %p148_p0 }
   0x7   :  { %156 = shalt.err (!%p153_p2)
}
   0x8   :  { %s157_s21 = scalar_lea.vmem %s18_s13, 256  ;;  %p162_p4 = scmp.lt.s32.totalorder %s18_s13, %s18_s13 }
   0x9   :  { %p158_p3 = scmp.ne.s32.totalorder %s18_s13, %s157_s21  ;;  %p163_p5 = scmp.lt.s32.totalorder %s157_s21, %s157_s21 }
   0xb   :  { %p164_p6 = por %p163_p5, %p162_p4 }
   0xd   :  { %p165_p7 = pnand %p164_p6, %p158_p3 }
   0xf   :  { %168 = shalt.err (!%p165_p7)
}
  0x10   :  { %s196_s22 = smov 128   ;;  %s197_s23 = smov 8  }
  0x11   :  { %23 = dma.hbm_to_vmem [thread:$0]  %s253_s1, 256, %s18_s13, [#allocation3], %s196_s22, %s196_s22, %s197_s23  }
  0x12   :  { %191 = dma.done.wait [#allocation3], 256  }
  0x13   :  { %192 = vsyncadd [#allocation3], 4294967040  ;;  %v198_v0 = vmov 0.0|0.0   ;;  %vm199_vm0 = vmmov 0   ;;  %v200_v1 = vmov 0.0   ;;  %v30_v2 = vld [vmem:[#allocation2] sm:$0xff] }
  0x14   :  { %137 = vmatprep.subr.bf16.mxu0 %v198_v0  ;;  %134 = vmatprep.mubr.msk.f32.mxu0 %vm199_vm0, %v200_v1  ;;  %v31_v3 = vld [vmem:[#allocation2 + $0x8] sm:$0xff]  ;;  %v29_v5 = vld [vmem:[%s252_s0] sm:$0x3]  ;;  %s201_s1 = smov [#allocation5]   ;;  %vm109_vm1 = vcmask 123904  }
  0x15   :  { %v138_v4 = vpack.c.bf16 %v31_v3, %v30_v2  ;;  %v126_v6 = vld [vmem:[%s254_s2] ss:$0 sm:$0xff]  ;;  %s117_s30 = sshll.u32 %s201_s1, 4  ;;  %s118_s30 = int_to_ptr.vmem [resolvable:$true] %s117_s30 }
  0x16   :  { %s169_s4 = scalar_lea.vmem %s118_s30, 32  ;;  %p174_p9 = scmp.lt.s32.totalorder %s118_s30, %s118_s30 }
  0x17   :  { %139 = vmatpush3.bf16.xpose.msra.mxu0 %v138_v4  ;;  %p170_p8 = scmp.ne.s32.totalorder %s118_s30, %s169_s4  ;;  %p175_p10 = scmp.lt.s32.totalorder %s169_s4, %s169_s4 }
  0x19   :  { %p176_p11 = por %p175_p10, %p174_p9 }
  0x1b   :  { %p177_p12 = pnand %p176_p11, %p170_p8 }
  0x1e   :  { %135 = vmatmul.mubr.f32.vlgmr.msra.gmra.mrb[0].mxu0 %v29_v5 }
  0xf1   :  { %v105_v7 = vpop.f32.mrb[0].mxu0 }
  0xf2   :  { %v106_v8 = vadd.f32 %v126_v6, %v105_v7  ;;  %v136_v9 = vpop.f32.mrb[1].mxu0 }
  0xf4   :  { %110 = vst.msk [vmem:[#allocation5] sm:$0x3] %vm109_vm1, %v106_v8 }
  0xf5   :  { %180 = shalt.err (!%p177_p12)
}
  0xf6   :  { %s181_s6 = scalar_lea.hbm %s255_s3, 32 }
  0xf7   :  { %p182_p13 = scmp.ne.s32.totalorder %s255_s3, %s181_s6  ;;  %p185_p0 = scmp.lt.u32.totalorder %s181_s6, %s255_s3 }
  0xf9   :  { %p187_p1 = pnand %p185_p0, %p182_p13 }
  0xfb   :  { %190 = shalt.err (!%p187_p1)
}
  0xfc   :  { %120 = dma.vmem_to_hbm [thread:$0]  %s118_s30, 32, %s255_s3, [#allocation4]  }
  0xfd   :  { %193 = dma.done.wait [#allocation4], 32  }
  0xfe   :  { %194 = vsyncadd [#allocation4], 4294967264 }
  0xff   :  { %124 = vsyncpa [#allocation3], 1 }
 0x100   :  { %125 = vsyncpa [#allocation4], 1 }

</bundles_post_ra>
